<compile_context>
chip_gen: v7x
topology: tpu7x:2x2x1
jax: 0.10.0
libtpu: 0.0.40
codegen_flags: <defaults>
</compile_context>

<pallas_src>
import functools

import jax
import jax.numpy as jnp
from jax import lax
from jax.experimental import pallas as pl
from jax.experimental.pallas import tpu as pltpu

_LANE = 128
_EPS = 1e-5


def _round_up(n, m):
    return ((n + m - 1) // m) * m


def _vmem_capacity_bytes():
    """Physical per-core VMEM; conservative 64 MiB (v7x) fallback."""
    try:
        return int(pltpu.get_tpu_info().vmem_capacity_bytes)
    except Exception:
        return 64 << 20


def _block_forward(x, w1, w2, vecs, *, hp, dp, matmul_dtype):
    """One MLPBlock on an f32 residual-stream tile x of shape (B, Dp).

    Matmuls run on the MXU in `matmul_dtype` (weights already stored in that
    dtype) with f32 accumulation; BN / ReLU / residual stay in f32.
    b1 is omitted: BatchNorm's batch-mean subtraction cancels it exactly.
    """
    gamma = vecs[0:1, :hp]
    beta = vecs[1:2, :hp]
    b2 = vecs[2:3, :dp]

    h = jnp.dot(x.astype(matmul_dtype), w1,
                preferred_element_type=jnp.float32)              # (B, Hp) f32

    inv_b = jnp.float32(1.0 / x.shape[0])
    mean = jnp.sum(h, axis=0, keepdims=True) * inv_b             # (1, Hp)
    d = h - mean                                                 # centered
    var = jnp.sum(d * d, axis=0, keepdims=True) * inv_b          # two-pass var
    s = gamma * lax.rsqrt(var + jnp.float32(_EPS))               # EUP rsqrt
    a = jnp.maximum(d * s + beta, 0.0)                           # BN + ReLU

    y = jnp.dot(a.astype(matmul_dtype), w2,
                preferred_element_type=jnp.float32) + b2         # (B, Dp) f32
    return x + y


def _fused_kernel(x_ref, w1_ref, w2_ref, vecs_ref, wh_ref, bh_ref, out_ref,
                  *, n_blocks, hp, dp, matmul_dtype):
    """Single grid-less call: all stacked weights VMEM-resident, loop unrolled."""
    x = x_ref[...].astype(jnp.float32)
    for i in range(n_blocks):          # static, fully unrolled
        x = _block_forward(x, w1_ref[i], w2_ref[i], vecs_ref[i],
                           hp=hp, dp=dp, matmul_dtype=matmul_dtype)
    out = jnp.sum(x * wh_ref[...], axis=-1, keepdims=True) + bh_ref[...]
    out_ref[...] = out.astype(out_ref.dtype)


def _streamed_kernel(x_ref, w1_ref, w2_ref, vecs_ref, wh_ref, bh_ref, out_ref,
                     x_acc, *, hp, dp, matmul_dtype):
    """grid=(n_blocks,): one block's weights per step, residual in VMEM scratch."""
    i = pl.program_id(0)

    @pl.when(i == 0)
    def _():
        x_acc[...] = x_ref[...].astype(jnp.float32)

    x_new = _block_forward(x_acc[...], w1_ref[...], w2_ref[...], vecs_ref[...],
                           hp=hp, dp=dp, matmul_dtype=matmul_dtype)
    x_acc[...] = x_new

    @pl.when(i == pl.num_programs(0) - 1)
    def _():
        out = jnp.sum(x_new * wh_ref[...], axis=-1, keepdims=True) + bh_ref[...]
        out_ref[...] = out.astype(out_ref.dtype)


def mlp_forward(x, params, *, matmul_dtype=jnp.bfloat16, force_stream=False):
    """params = (w1, b1, gamma, beta, w2, b2, wh, bh), natural PyTorch shapes."""
    w1, b1, gamma, beta, w2, b2, wh, bh = params
    del b1   # exactly cancelled by BatchNorm's batch-mean subtraction
    n_blocks, D, H = w1.shape
    B = x.shape[0]
    Dp, Hp = _round_up(D, _LANE), _round_up(H, _LANE)
    P = max(Dp, Hp)

    # ---- lane-dense padding + dtype packing (layout plumbing, in wrapper) ---
    def pad2(a, r, c):
        return jnp.pad(a, ((0, 0), (0, r - a.shape[1]), (0, c - a.shape[2])))

    w1p = pad2(w1, Dp, Hp).astype(matmul_dtype)   # zero pad rows/cols
    w2p = pad2(w2, Hp, Dp).astype(matmul_dtype)   # zero pad rows kill pad-lane leaks
    # gamma / beta / b2 packed into one streamed array; zero on padded columns
    # so rsqrt(eps)*beta on padded lanes cannot leak into the residual.
    vecs = jnp.zeros((n_blocks, 3, P), jnp.float32)
    vecs = vecs.at[:, 0, :H].set(gamma[:, 0, :])
    vecs = vecs.at[:, 1, :H].set(beta[:, 0, :])
    vecs = vecs.at[:, 2, :D].set(b2[:, 0, :])
    xp = jnp.pad(x.astype(jnp.float32), ((0, 0), (0, Dp - D)))
    whp = jnp.pad(wh.astype(jnp.float32), ((0, 0), (0, Dp - D)))
    bhf = bh.astype(jnp.float32)
    operands = (xp, w1p, w2p, vecs, whp, bhf)

    # ---- budgets / dispatch --------------------------------------------------
    w_item = jnp.dtype(matmul_dtype).itemsize
    param_bytes = n_blocks * (2 * Dp * Hp * w_item + 3 * P * 4) + (Dp + 1) * 4
    act_bytes = 4 * B * (3 * Hp + 3 * Dp)          # h/d/a + x/residual/y
    io_bytes = 4 * B * (Dp + 1)
    vmem_cap = _vmem_capacity_bytes()
    use_fused = (not force_stream) and 4 * (param_bytes + act_bytes) <= vmem_cap

    cost = pl.CostEstimate(
        flops=int(n_blocks * 4 * B * Dp * Hp + 2 * B * Dp),
        transcendentals=int(n_blocks * Hp),
        bytes_accessed=int(param_bytes + io_bytes))

    out_shape = jax.ShapeDtypeStruct((B, 1), x.dtype)

    if use_fused:
        need = param_bytes + act_bytes + io_bytes + (8 << 20)
        vmem_limit = int(min(max(need, 16 << 20), int(0.85 * vmem_cap)))
        kernel = functools.partial(_fused_kernel, n_blocks=n_blocks,
                                   hp=Hp, dp=Dp, matmul_dtype=matmul_dtype)
        return pl.pallas_call(
            kernel,
            out_shape=out_shape,
            compiler_params=pltpu.CompilerParams(vmem_limit_bytes=vmem_limit),
            cost_estimate=cost,
        )(*operands)

    # ---- streamed path: grid=(n_blocks,), per-block weights double-buffered --
    per_block = 2 * Dp * Hp * w_item + 3 * P * 4
    need = (2 * 2 * per_block                 # double-buffered streamed weights
            + 2 * 4 * (B * Dp + Dp + 1)       # x / wh / bh (+ pipeline copies)
            + 4 * B * Dp                      # residual carry scratch
            + act_bytes + (8 << 20))
    vmem_limit = int(min(max(need, 16 << 20), int(0.85 * vmem_cap)))
    kernel = functools.partial(_streamed_kernel, hp=Hp, dp=Dp,
                               matmul_dtype=matmul_dtype)
    return pl.pallas_call(
        kernel,
        out_shape=out_shape,
        grid_spec=pltpu.PrefetchScalarGridSpec(
            num_scalar_prefetch=0,
            grid=(n_blocks,),
            in_specs=[
                pl.BlockSpec((B, Dp), lambda i: (0, 0)),
                pl.BlockSpec((None, Dp, Hp), lambda i: (i, 0, 0)),
                pl.BlockSpec((None, Hp, Dp), lambda i: (i, 0, 0)),
                pl.BlockSpec((None, 3, P), lambda i: (i, 0, 0)),
                pl.BlockSpec((1, Dp), lambda i: (0, 0)),
                pl.BlockSpec((1, 1), lambda i: (0, 0)),
            ],
            out_specs=pl.BlockSpec((B, 1), lambda i: (0, 0)),
            scratch_shapes=[pltpu.VMEM((B, Dp), jnp.float32)],
        ),
        compiler_params=pltpu.CompilerParams(
            dimension_semantics=("arbitrary",),   # carried residual dependency
            vmem_limit_bytes=vmem_limit),
        cost_estimate=cost,
    )(*operands)


def init_params(key, input_dim, hidden_dim, n_blocks):
    """PyTorch-like init. Linear weights as (in, out) ~ U(-1/sqrt(in), 1/sqrt(in));
    BatchNorm gamma=1, beta=0. Head stored as (1, input_dim)."""
    ks = jax.random.split(key, 6)

    def unif(k, shape, fan_in):
        bound = 1.0 / jnp.sqrt(jnp.float32(fan_in))
        return jax.random.uniform(k, shape, jnp.float32, -bound, bound)

    w1 = unif(ks[0], (n_blocks, input_dim, hidden_dim), input_dim)
    b1 = unif(ks[1], (n_blocks, 1, hidden_dim), input_dim)
    gamma = jnp.ones((n_blocks, 1, hidden_dim), jnp.float32)
    beta = jnp.zeros((n_blocks, 1, hidden_dim), jnp.float32)
    w2 = unif(ks[2], (n_blocks, hidden_dim, input_dim), hidden_dim)
    b2 = unif(ks[3], (n_blocks, 1, input_dim), hidden_dim)
    wh = unif(ks[4], (1, input_dim), input_dim)
    bh = unif(ks[5], (1, 1), input_dim)
    return (w1, b1, gamma, beta, w2, b2, wh, bh)


def mlp_reference(x, params, *, matmul_dtype=jnp.float32):
    """Pure-JAX reference of the PyTorch training-mode forward (b1 included).

    Matmul operands are rounded to `matmul_dtype` (f32 accumulate) so the
    reference mirrors the kernel's MXU numerics; f32 gives exact PyTorch math.
    """
    w1, b1, gamma, beta, w2, b2, wh, bh = params

    def mm(a, b):
        return jnp.dot(a.astype(matmul_dtype).astype(jnp.float32),
                       b.astype(matmul_dtype).astype(jnp.float32),
                       preferred_element_type=jnp.float32)

    xf = x.astype(jnp.float32)
    for i in range(w1.shape[0]):
        h = mm(xf, w1[i]) + b1[i]
        mean = jnp.mean(h, axis=0, keepdims=True)
        var = jnp.mean((h - mean) ** 2, axis=0, keepdims=True)
        a = jnp.maximum((h - mean) * lax.rsqrt(var + _EPS) * gamma[i] + beta[i],
                        0.0)
        xf = xf + mm(a, w2[i]) + b2[i]
    return (jnp.sum(xf * wh, axis=-1, keepdims=True) + bh).astype(x.dtype)


if __name__ == "__main__":
    B = 8            # batch
    INPUT_DIM = 32   # input_dim
    HIDDEN_DIM = 64  # mlp_hidden_dim
    N_BLOCKS = 2     # n_blocks

    key = jax.random.PRNGKey(0)
    kx, kp = jax.random.split(key)
    x = jax.random.normal(kx, (B, INPUT_DIM), jnp.float32)
    params = init_params(kp, INPUT_DIM, HIDDEN_DIM, N_BLOCKS)

    ref = mlp_reference(x, params, matmul_dtype=jnp.bfloat16)

    # Small model -> fused, grid-less path (size-based dispatch).
    out = mlp_forward(x, params, matmul_dtype=jnp.bfloat16)
    jax.block_until_ready(out)
    assert out.shape == (B, 1)
    assert jnp.allclose(out, ref, rtol=2e-3, atol=2e-3), (
        f"fused: max abs diff {jnp.max(jnp.abs(out - ref))}")

    # Also exercise the weight-streaming grid path.
    out_s = mlp_forward(x, params, matmul_dtype=jnp.bfloat16, force_stream=True)
    jax.block_until_ready(out_s)
    assert jnp.allclose(out_s, ref, rtol=2e-3, atol=2e-3), (
        f"streamed: max abs diff {jnp.max(jnp.abs(out_s - ref))}")

    print("KERNEL_OK")
</pallas_src>

<mosaic_0001>
module attributes {stable_mosaic.version = 11 : i64} {
  func.func @_fused_kernel(%arg0: memref<8x128xf32, #tpu.memory_space<vmem>>, %arg1: memref<2x128x128xbf16, #tpu.memory_space<vmem>>, %arg2: memref<2x128x128xbf16, #tpu.memory_space<vmem>>, %arg3: memref<2x3x128xf32, #tpu.memory_space<vmem>>, %arg4: memref<1x128xf32, #tpu.memory_space<vmem>>, %arg5: memref<1x1xf32, #tpu.memory_space<vmem>>, %arg6: memref<8x1xf32, #tpu.memory_space<vmem>>) attributes {dimension_semantics = [], scalar_prefetch = 0 : i64, scratch_operands = 0 : i64, tpu.core_type = #tpu.core_type<tc>} {
    %c0 = arith.constant 0 : index
    %c0_0 = arith.constant 0 : index
    %0 = vector.load %arg0[%c0, %c0_0] : memref<8x128xf32, #tpu.memory_space<vmem>>, vector<8x128xf32>
    %c0_1 = arith.constant 0 : index
    %c0_2 = arith.constant 0 : index
    %c0_3 = arith.constant 0 : index
    %1 = vector.load %arg1[%c0_1, %c0_2, %c0_3] : memref<2x128x128xbf16, #tpu.memory_space<vmem>>, vector<1x128x128xbf16>
    %2 = vector.shape_cast %1 : vector<1x128x128xbf16> to vector<128x128xbf16>
    %c0_4 = arith.constant 0 : index
    %c0_5 = arith.constant 0 : index
    %c0_6 = arith.constant 0 : index
    %3 = vector.load %arg2[%c0_4, %c0_5, %c0_6] : memref<2x128x128xbf16, #tpu.memory_space<vmem>>, vector<1x128x128xbf16>
    %4 = vector.shape_cast %3 : vector<1x128x128xbf16> to vector<128x128xbf16>
    %c0_7 = arith.constant 0 : index
    %c0_8 = arith.constant 0 : index
    %c0_9 = arith.constant 0 : index
    %5 = vector.load %arg3[%c0_7, %c0_8, %c0_9] : memref<2x3x128xf32, #tpu.memory_space<vmem>>, vector<1x3x128xf32>
    %6 = vector.shape_cast %5 : vector<1x3x128xf32> to vector<3x128xf32>
    %7 = vector.extract_strided_slice %6 {offsets = [0, 0], sizes = [1, 128], strides = [1, 1]} : vector<3x128xf32> to vector<1x128xf32>
    %8 = vector.extract_strided_slice %6 {offsets = [1, 0], sizes = [1, 128], strides = [1, 1]} : vector<3x128xf32> to vector<1x128xf32>
    %9 = vector.extract_strided_slice %6 {offsets = [2, 0], sizes = [1, 128], strides = [1, 1]} : vector<3x128xf32> to vector<1x128xf32>
    %10 = arith.truncf %0 : vector<8x128xf32> to vector<8x128xbf16>
    %cst = arith.constant dense<0.000000e+00> : vector<8x128xf32>
    %11 = tpu.matmul %10, %2, %cst {dimension_numbers = #tpu.dot_dimension_numbers<[1], [0], [0], [1], [0, 0, 1, 1], [], []>} : vector<8x128xbf16>, vector<128x128xbf16>, vector<8x128xf32> -> vector<8x128xf32>
    %cst_10 = arith.constant dense<0.000000e+00> : vector<128xf32>
    %12 = vector.multi_reduction <add>, %11, %cst_10 [0] : vector<8x128xf32> to vector<128xf32>
    %13 = vector.shape_cast %12 : vector<128xf32> to vector<1x128xf32>
    %cst_11 = arith.constant 1.250000e-01 : f32
    %14 = vector.broadcast %cst_11 : f32 to vector<1x128xf32>
    %15 = arith.mulf %13, %14 : vector<1x128xf32>
    %16 = vector.broadcast %15 : vector<1x128xf32> to vector<8x128xf32>
    %17 = arith.subf %11, %16 : vector<8x128xf32>
    %18 = arith.mulf %17, %17 : vector<8x128xf32>
    %cst_12 = arith.constant dense<0.000000e+00> : vector<128xf32>
    %19 = vector.multi_reduction <add>, %18, %cst_12 [0] : vector<8x128xf32> to vector<128xf32>
    %20 = vector.shape_cast %19 : vector<128xf32> to vector<1x128xf32>
    %cst_13 = arith.constant 1.250000e-01 : f32
    %21 = vector.broadcast %cst_13 : f32 to vector<1x128xf32>
    %22 = arith.mulf %20, %21 : vector<1x128xf32>
    %cst_14 = arith.constant 9.99999974E-6 : f32
    %23 = vector.broadcast %cst_14 : f32 to vector<1x128xf32>
    %24 = arith.addf %22, %23 : vector<1x128xf32>
    %25 = math.rsqrt %24 : vector<1x128xf32>
    %26 = arith.mulf %7, %25 : vector<1x128xf32>
    %27 = vector.broadcast %26 : vector<1x128xf32> to vector<8x128xf32>
    %28 = arith.mulf %17, %27 : vector<8x128xf32>
    %29 = vector.broadcast %8 : vector<1x128xf32> to vector<8x128xf32>
    %30 = arith.addf %28, %29 : vector<8x128xf32>
    %cst_15 = arith.constant 0.000000e+00 : f32
    %31 = vector.broadcast %cst_15 : f32 to vector<8x128xf32>
    %32 = arith.maximumf %30, %31 : vector<8x128xf32>
    %33 = arith.truncf %32 : vector<8x128xf32> to vector<8x128xbf16>
    %cst_16 = arith.constant dense<0.000000e+00> : vector<8x128xf32>
    %34 = tpu.matmul %33, %4, %cst_16 {dimension_numbers = #tpu.dot_dimension_numbers<[1], [0], [0], [1], [0, 0, 1, 1], [], []>} : vector<8x128xbf16>, vector<128x128xbf16>, vector<8x128xf32> -> vector<8x128xf32>
    %35 = vector.broadcast %9 : vector<1x128xf32> to vector<8x128xf32>
    %36 = arith.addf %34, %35 : vector<8x128xf32>
    %37 = arith.addf %0, %36 : vector<8x128xf32>
    %c1 = arith.constant 1 : index
    %c0_17 = arith.constant 0 : index
    %c0_18 = arith.constant 0 : index
    %38 = vector.load %arg1[%c1, %c0_17, %c0_18] : memref<2x128x128xbf16, #tpu.memory_space<vmem>>, vector<1x128x128xbf16>
    %39 = vector.shape_cast %38 : vector<1x128x128xbf16> to vector<128x128xbf16>
    %c1_19 = arith.constant 1 : index
    %c0_20 = arith.constant 0 : index
    %c0_21 = arith.constant 0 : index
    %40 = vector.load %arg2[%c1_19, %c0_20, %c0_21] : memref<2x128x128xbf16, #tpu.memory_space<vmem>>, vector<1x128x128xbf16>
    %41 = vector.shape_cast %40 : vector<1x128x128xbf16> to vector<128x128xbf16>
    %c1_22 = arith.constant 1 : index
    %c0_23 = arith.constant 0 : index
    %c0_24 = arith.constant 0 : index
    %42 = vector.load %arg3[%c1_22, %c0_23, %c0_24] : memref<2x3x128xf32, #tpu.memory_space<vmem>>, vector<1x3x128xf32>
    %43 = vector.shape_cast %42 : vector<1x3x128xf32> to vector<3x128xf32>
    %44 = vector.extract_strided_slice %43 {offsets = [0, 0], sizes = [1, 128], strides = [1, 1]} : vector<3x128xf32> to vector<1x128xf32>
    %45 = vector.extract_strided_slice %43 {offsets = [1, 0], sizes = [1, 128], strides = [1, 1]} : vector<3x128xf32> to vector<1x128xf32>
    %46 = vector.extract_strided_slice %43 {offsets = [2, 0], sizes = [1, 128], strides = [1, 1]} : vector<3x128xf32> to vector<1x128xf32>
    %47 = arith.truncf %37 : vector<8x128xf32> to vector<8x128xbf16>
    %cst_25 = arith.constant dense<0.000000e+00> : vector<8x128xf32>
    %48 = tpu.matmul %47, %39, %cst_25 {dimension_numbers = #tpu.dot_dimension_numbers<[1], [0], [0], [1], [0, 0, 1, 1], [], []>} : vector<8x128xbf16>, vector<128x128xbf16>, vector<8x128xf32> -> vector<8x128xf32>
    %cst_26 = arith.constant dense<0.000000e+00> : vector<128xf32>
    %49 = vector.multi_reduction <add>, %48, %cst_26 [0] : vector<8x128xf32> to vector<128xf32>
    %50 = vector.shape_cast %49 : vector<128xf32> to vector<1x128xf32>
    %cst_27 = arith.constant 1.250000e-01 : f32
    %51 = vector.broadcast %cst_27 : f32 to vector<1x128xf32>
    %52 = arith.mulf %50, %51 : vector<1x128xf32>
    %53 = vector.broadcast %52 : vector<1x128xf32> to vector<8x128xf32>
    %54 = arith.subf %48, %53 : vector<8x128xf32>
    %55 = arith.mulf %54, %54 : vector<8x128xf32>
    %cst_28 = arith.constant dense<0.000000e+00> : vector<128xf32>
    %56 = vector.multi_reduction <add>, %55, %cst_28 [0] : vector<8x128xf32> to vector<128xf32>
    %57 = vector.shape_cast %56 : vector<128xf32> to vector<1x128xf32>
    %cst_29 = arith.constant 1.250000e-01 : f32
    %58 = vector.broadcast %cst_29 : f32 to vector<1x128xf32>
    %59 = arith.mulf %57, %58 : vector<1x128xf32>
    %cst_30 = arith.constant 9.99999974E-6 : f32
    %60 = vector.broadcast %cst_30 : f32 to vector<1x128xf32>
    %61 = arith.addf %59, %60 : vector<1x128xf32>
    %62 = math.rsqrt %61 : vector<1x128xf32>
    %63 = arith.mulf %44, %62 : vector<1x128xf32>
    %64 = vector.broadcast %63 : vector<1x128xf32> to vector<8x128xf32>
    %65 = arith.mulf %54, %64 : vector<8x128xf32>
    %66 = vector.broadcast %45 : vector<1x128xf32> to vector<8x128xf32>
    %67 = arith.addf %65, %66 : vector<8x128xf32>
    %cst_31 = arith.constant 0.000000e+00 : f32
    %68 = vector.broadcast %cst_31 : f32 to vector<8x128xf32>
    %69 = arith.maximumf %67, %68 : vector<8x128xf32>
    %70 = arith.truncf %69 : vector<8x128xf32> to vector<8x128xbf16>
    %cst_32 = arith.constant dense<0.000000e+00> : vector<8x128xf32>
    %71 = tpu.matmul %70, %41, %cst_32 {dimension_numbers = #tpu.dot_dimension_numbers<[1], [0], [0], [1], [0, 0, 1, 1], [], []>} : vector<8x128xbf16>, vector<128x128xbf16>, vector<8x128xf32> -> vector<8x128xf32>
    %72 = vector.broadcast %46 : vector<1x128xf32> to vector<8x128xf32>
    %73 = arith.addf %71, %72 : vector<8x128xf32>
    %74 = arith.addf %37, %73 : vector<8x128xf32>
    %c0_33 = arith.constant 0 : index
    %c0_34 = arith.constant 0 : index
    %75 = vector.load %arg4[%c0_33, %c0_34] : memref<1x128xf32, #tpu.memory_space<vmem>>, vector<1x128xf32>
    %76 = vector.broadcast %75 : vector<1x128xf32> to vector<8x128xf32>
    %77 = arith.mulf %74, %76 : vector<8x128xf32>
    %cst_35 = arith.constant dense<0.000000e+00> : vector<8xf32>
    %78 = vector.multi_reduction <add>, %77, %cst_35 [1] : vector<8x128xf32> to vector<8xf32>
    %79 = vector.shape_cast %78 : vector<8xf32> to vector<8x1xf32>
    %c0_36 = arith.constant 0 : index
    %c0_37 = arith.constant 0 : index
    %80 = vector.load %arg5[%c0_36, %c0_37] : memref<1x1xf32, #tpu.memory_space<vmem>>, vector<1x1xf32>
    %81 = vector.broadcast %80 : vector<1x1xf32> to vector<8x1xf32>
    %82 = arith.addf %79, %81 : vector<8x1xf32>
    %c0_38 = arith.constant 0 : index
    %c0_39 = arith.constant 0 : index
    %83 = vector.load %arg6[%c0_38, %c0_39] : memref<8x1xf32, #tpu.memory_space<vmem>>, vector<8x1xf32>
    tpu.vector_store %arg6[%c0_38, %c0_39], %82 {strides = array<i32>} : memref<8x1xf32, #tpu.memory_space<vmem>>, vector<8x1xf32>,
    return
  }
}

</mosaic_0001>

<bundles_post_ra>
// kernel: tpu_custom_call.1
= control target key start
LH: loop header
LB: loop body
LE: loop exit
PB: predicated region body
PF: predicated region fallthrough
CT: control target
= control target key end

     0   :  { %s967_s0 = inlined_call_operand.vmem [shape: f32[8,128], index: 0, kind: input, shape index: {}]   ;;  %s968_s1 = inlined_call_operand.hbm [shape: bf16[2,128,128], index: 1, kind: input, shape index: {}]   ;;  %s969_s2 = inlined_call_operand.hbm [shape: bf16[2,128,128], index: 2, kind: input, shape index: {}]   ;;  %s970_s3 = inlined_call_operand.vmem [shape: f32[2,3,128], index: 3, kind: input, shape index: {}]   ;;  %s971_s4 = inlined_call_operand.vmem [shape: f32[1,128], index: 4, kind: input, shape index: {}]   ;;  %s972_s5 = inlined_call_operand.<no memory space> [shape: f32[1,1], index: 5, kind: input, shape index: {}]   ;;  %s973_s6 = inlined_call_operand.vmem [shape: f32[8,1], index: 6, kind: output, shape index: {}]  }
   0x1   :  { %v11_v0 = vstv %s972_s5 }
   0x2   :  { %12 = vst [vmem:[#allocation2] sm:$0x1] %v11_v0 }
   0x3   :  { %13 = vsyncpa [#allocation4], 0 }
   0x4   :  { %14 = vsyncpa [#allocation6], 0  ;;  %s817_s23 = smov [#allocation3]   ;;  %s769_s27 = scalar_lea.hbm %s968_s1, 2048 }
   0x5   :  { %s22_s24 = sshll.u32 %s817_s23, 4  ;;  %p770_p0 = scmp.ne.s32.totalorder %s968_s1, %s769_s27  ;;  %s23_s24 = int_to_ptr.vmem [resolvable:$true] %s22_s24 }
   0x6   :  { %p773_p1 = scmp.lt.u32.totalorder %s769_s27, %s968_s1 }
   0x8   :  { %p775_p2 = pnand %p773_p1, %p770_p0 }
   0xa   :  { %778 = shalt.err (!%p775_p2)
}
   0xb   :  { %s779_s5 = scalar_lea.vmem %s23_s24, 2048  ;;  %p784_p4 = scmp.lt.s32.totalorder %s23_s24, %s23_s24 }
   0xc   :  { %p780_p3 = scmp.ne.s32.totalorder %s23_s24, %s779_s5  ;;  %p785_p5 = scmp.lt.s32.totalorder %s779_s5, %s779_s5 }
   0xe   :  { %p786_p6 = por %p785_p5, %p784_p4 }
  0x10   :  { %p787_p7 = pnand %p786_p6, %p780_p3 }
  0x12   :  { %790 = shalt.err (!%p787_p7)
}
  0x13   :  { %s818_s8 = smov 64   ;;  %s819_s9 = smov 4  }
  0x14   :  { %28 = dma.hbm_to_vmem [thread:$0]  %s968_s1, 2048, %s23_s24, [#allocation4], %s818_s8, %s818_s8, %s819_s9  }
  0x15   :  { %s820_s12 = smov [#allocation5]   ;;  %s791_s16 = scalar_lea.hbm %s969_s2, 2048 }
  0x16   :  { %s34_s13 = sshll.u32 %s820_s12, 4  ;;  %p792_p8 = scmp.ne.s32.totalorder %s969_s2, %s791_s16  ;;  %s35_s13 = int_to_ptr.vmem [resolvable:$true] %s34_s13 }
  0x17   :  { %p795_p9 = scmp.lt.u32.totalorder %s791_s16, %s969_s2 }
  0x19   :  { %p797_p10 = pnand %p795_p9, %p792_p8 }
  0x1b   :  { %800 = shalt.err (!%p797_p10)
}
  0x1c   :  { %s801_s21 = scalar_lea.vmem %s35_s13, 2048  ;;  %p806_p12 = scmp.lt.s32.totalorder %s35_s13, %s35_s13 }
  0x1d   :  { %p802_p11 = scmp.ne.s32.totalorder %s35_s13, %s801_s21  ;;  %p807_p13 = scmp.lt.s32.totalorder %s801_s21, %s801_s21 }
  0x1f   :  { %p808_p0 = por %p807_p13, %p806_p12 }
  0x21   :  { %p809_p1 = pnand %p808_p0, %p802_p11 }
  0x23   :  { %812 = shalt.err (!%p809_p1)
}
  0x24   :  { %40 = dma.hbm_to_vmem [thread:$0]  %s969_s2, 2048, %s35_s13, [#allocation6], %s818_s8, %s818_s8, %s819_s9  }
  0x25   :  { %813 = dma.done.wait [#allocation4], 2048  }
  0x26   :  { %814 = vsyncadd [#allocation4], 4294965248 }
  0x27   :  { %815 = dma.done.wait [#allocation6], 2048  }
  0x28   :  { %816 = vsyncadd [#allocation6], 4294965248  ;;  %v821_v1 = vmov 0.0   ;;  %vm822_vm0 = vmmov 0   ;;  %v733_v2 = vld [vmem:[#allocation3] sm:$0xff]   ;;  %v734_v3 = vld [vmem:[#allocation3 + $0x8] sm:$0xff]   ;;  %v196_v47 = vlaneseq }
  0x29   :  { %647 = vmatprep.subr.bf16.mxu0 %v821_v1  ;;  %663 = vmatprep.mubr.msk.bf16.mxu0 %vm822_vm0, %v821_v1  ;;  %v735_v4 = vld [vmem:[#allocation3 + $0x10] sm:$0xff]   ;;  %v736_v5 = vld [vmem:[#allocation3 + $0x18] sm:$0xff]   ;;  %v737_v6 = vld [vmem:[#allocation3 + $0x20] sm:$0xff]   ;;  %vm568_vm1 = vcmask 7168  }
  0x2a   :  { %667 = vmatprep.subr.bf16.mxu1 %v821_v1  ;;  %683 = vmatprep.mubr.msk.bf16.mxu1 %vm822_vm0, %v821_v1  ;;  %v738_v7 = vld [vmem:[#allocation3 + $0x28] sm:$0xff]   ;;  %v739_v8 = vld [vmem:[#allocation3 + $0x30] sm:$0xff]   ;;  %v740_v9 = vld [vmem:[#allocation3 + $0x38] sm:$0xff]   ;;  %v922_v48 = vshrl.u32 %v196_v47, 7 }
  0x2b   :  { %648 = vmatpush3.bf16.msra.mxu0 %v733_v2  ;;  %v900_v10 = vld [vmem:[%s967_s0] sm:$0xff]  ;;  %v742_v13 = vld [vmem:[#allocation5 + $0x8] sm:$0xff]   ;;  %v743_v14 = vld [vmem:[#allocation5 + $0x10] sm:$0xff]  }
  0x2c   :  { %649 = vmatprep.subr.bf16.mxu0 %v821_v1  ;;  %v88_v11 = vpack.c.bf16 %v900_v10, %v900_v10  ;;  %v741_v12 = vld [vmem:[#allocation5] sm:$0xff]   ;;  %v744_v15 = vld [vmem:[#allocation5 + $0x18] sm:$0xff]   ;;  %v746_v17 = vld [vmem:[#allocation5 + $0x28] sm:$0xff]   ;;  %v198_v50 = vsub.s32 0, %v922_v48  ;;  %v203_v51 = vsub.s32 1, %v922_v48  ;;  %v210_v62 = vsub.s32 2, %v922_v48 }
  0x2d   :  { %668 = vmatpush3.bf16.msra.mxu1 %v741_v12  ;;  %v745_v16 = vld [vmem:[#allocation5 + $0x20] sm:$0xff]   ;;  %v747_v18 = vld [vmem:[#allocation5 + $0x30] sm:$0xff]   ;;  %v748_v19 = vld [vmem:[#allocation5 + $0x38] sm:$0xff]  }
  0x2e   :  { %669 = vmatprep.subr.bf16.mxu1 %v821_v1  ;;  %v749_v20 = vld [vmem:[#allocation3 + $0x40] sm:$0xff]   ;;  %v750_v21 = vld [vmem:[#allocation3 + $0x48] sm:$0xff]   ;;  %v751_v22 = vld [vmem:[#allocation3 + $0x50] sm:$0xff]  }
  0x2f   :  { %650 = vmatpush3.bf16.msra.mxu0 %v734_v3  ;;  %v752_v23 = vld [vmem:[#allocation3 + $0x58] sm:$0xff]   ;;  %v753_v24 = vld [vmem:[#allocation3 + $0x60] sm:$0xff]   ;;  %v754_v25 = vld [vmem:[#allocation3 + $0x68] sm:$0xff]  }
  0x30   :  { %651 = vmatprep.subr.bf16.mxu0 %v821_v1  ;;  %v87_v49 = vld [vmem:[%s970_s3] sm:$0x7]  ;;  %v755_v60 = vld [vmem:[#allocation3 + $0x70] sm:$0xff]  }
  0x31   :  { %670 = vmatpush3.bf16.msra.mxu1 %v742_v13  ;;  %v204_v55 = vrot.slane %v87_v49, %v203_v51  ;;  %v756_v61 = vld [vmem:[#allocation3 + $0x78] sm:$0xff]   ;;  %v211_v63 = vrot.slane %v87_v49, %v210_v62  ;;  %v762_v13 = vld [vmem:[#allocation5 + $0x68] sm:$0xff]  }
  0x32   :  { %671 = vmatprep.subr.bf16.mxu1 %v821_v1  ;;  %v760_v12 = vld [vmem:[#allocation5 + $0x58] sm:$0xff]  }
  0x33   :  { %652 = vmatpush3.bf16.msra.mxu0 %v735_v4 }
  0x34   :  { %653 = vmatprep.subr.bf16.mxu0 %v821_v1 }
  0x35   :  { %672 = vmatpush3.bf16.msra.mxu1 %v743_v14  ;;  %v763_v14 = vld [vmem:[#allocation5 + $0x70] sm:$0xff]  }
  0x36   :  { %673 = vmatprep.subr.bf16.mxu1 %v821_v1 }
  0x37   :  { %654 = vmatpush3.bf16.msra.mxu0 %v736_v5 }
  0x38   :  { %655 = vmatprep.subr.bf16.mxu0 %v821_v1 }
  0x39   :  { %674 = vmatpush3.bf16.msra.mxu1 %v744_v15  ;;  %v764_v15 = vld [vmem:[#allocation5 + $0x78] sm:$0xff]  }
  0x3a   :  { %675 = vmatprep.subr.bf16.mxu1 %v821_v1 }
  0x3b   :  { %656 = vmatpush3.bf16.msra.mxu0 %v737_v6 }
  0x3c   :  { %657 = vmatprep.subr.bf16.mxu0 %v821_v1 }
  0x3d   :  { %676 = vmatpush3.bf16.msra.mxu1 %v745_v16 }
  0x3e   :  { %677 = vmatprep.subr.bf16.mxu1 %v821_v1 }
  0x3f   :  { %658 = vmatpush3.bf16.msra.mxu0 %v738_v7 }
  0x40   :  { %659 = vmatprep.subr.bf16.mxu0 %v821_v1 }
  0x41   :  { %678 = vmatpush3.bf16.msra.mxu1 %v746_v17 }
  0x42   :  { %679 = vmatprep.subr.bf16.mxu1 %v821_v1 }
  0x43   :  { %660 = vmatpush3.bf16.msra.mxu0 %v739_v8  ;;  %v757_v8 = vld [vmem:[#allocation5 + $0x40] sm:$0xff]  }
  0x44   :  { %661 = vmatprep.subr.bf16.mxu0 %v821_v1 }
  0x45   :  { %680 = vmatpush3.bf16.msra.mxu1 %v747_v18 }
  0x46   :  { %681 = vmatprep.subr.bf16.mxu1 %v821_v1 }
  0x47   :  { %662 = vmatpush3.bf16.msra.mxu0 %v740_v9  ;;  %v758_v9 = vld [vmem:[#allocation5 + $0x48] sm:$0xff]  }
  0x48   :  { %687 = vmatprep.subr.bf16.mxu0 %v821_v1 }
  0x49   :  { %682 = vmatpush3.bf16.msra.mxu1 %v748_v19 }
  0x4a   :  { %664 = vmatmul.mubr.bf16.vlgmr.msra.gmra.mrb[0].mxu0 %v88_v11  ;;  %707 = vmatprep.subr.bf16.mxu1 %v821_v1  ;;  %v759_v11 = vld [vmem:[#allocation5 + $0x50] sm:$0xff]  }
  0x4b   :  { %703 = vmatprep.mubr.msk.bf16.mxu0 %vm822_vm0, %v821_v1  ;;  %688 = vmatpush3.bf16.msra.mxu0 %v749_v20 }
  0x4c   :  { %689 = vmatprep.subr.bf16.mxu0 %v821_v1 }
  0x4f   :  { %690 = vmatpush3.bf16.msra.mxu0 %v750_v21 }
  0x50   :  { %691 = vmatprep.subr.bf16.mxu0 %v821_v1 }
  0x53   :  { %692 = vmatpush3.bf16.msra.mxu0 %v751_v22 }
  0x54   :  { %693 = vmatprep.subr.bf16.mxu0 %v821_v1 }
  0x57   :  { %694 = vmatpush3.bf16.msra.mxu0 %v752_v23 }
  0x58   :  { %695 = vmatprep.subr.bf16.mxu0 %v821_v1 }
  0x5b   :  { %696 = vmatpush3.bf16.msra.mxu0 %v753_v24 }
  0x5c   :  { %697 = vmatprep.subr.bf16.mxu0 %v821_v1 }
  0x5f   :  { %698 = vmatpush3.bf16.msra.mxu0 %v754_v25 }
  0x60   :  { %699 = vmatprep.subr.bf16.mxu0 %v821_v1 }
  0x63   :  { %700 = vmatpush3.bf16.msra.mxu0 %v755_v60 }
  0x64   :  { %701 = vmatprep.subr.bf16.mxu0 %v821_v1 }
  0x67   :  { %702 = vmatpush3.bf16.msra.mxu0 %v756_v61 }
 0x11d   :  { %v171_v26 = vpop.f32.mrb[0].mxu0 }
 0x11e   :  { %v177_v27 = vrot.slane %v171_v26, 4  ;;  %v665_v28 = vpop.f32.mrb[1].mxu0 }
 0x11f   :  { %v174_v29 = vpop.f32.mrb[2].mxu0 }
 0x120   :  { %v178_v30 = vadd.f32 %v177_v27, %v171_v26  ;;  %v666_v31 = vpop.f32.mrb[3].mxu0 }
 0x122   :  { %v179_v32 = vrot.slane %v178_v30, 2 }
 0x124   :  { %v180_v33 = vadd.f32 %v179_v32, %v178_v30 }
 0x126   :  { %v181_v34 = vrot.slane %v180_v33, 1 }
 0x128   :  { %v182_v35 = vadd.f32 %v181_v34, %v180_v33 }
 0x12a   :  { %v183_v36 = vmul.f32 0.125, %v182_v35 }
 0x12c   :  { %v184_v37 = vsub.f32 %v171_v26, %v183_v36  ;;  %v592_v36 = vld [vmem:[%s970_s3 + $0x4] sm:$0x7] }
 0x12e   :  { %v185_v38 = vmul.f32 %v184_v37, %v184_v37 }
 0x130   :  { %v186_v39 = vrot.slane %v185_v38, 4 }
 0x132   :  { %v187_v40 = vadd.f32 %v186_v39, %v185_v38 }
 0x134   :  { %v188_v41 = vrot.slane %v187_v40, 2 }
 0x136   :  { %v189_v42 = vadd.f32 %v188_v41, %v187_v40  ;;  %v453_v40 = vrot.slane %v592_v36, %v203_v51 }
 0x138   :  { %v190_v43 = vrot.slane %v189_v42, 1 }
 0x13a   :  { %v191_v44 = vadd.f32 %v190_v43, %v189_v42 }
 0x13c   :  { %v192_v45 = vmul.f32 0.125, %v191_v44 }
 0x13e   :  { %v193_v46 = vadd.f32 1e-05, %v192_v45  ;;  %v460_v45 = vrot.slane %v592_v36, %v210_v62 }
 0x140   :  { %765 = vrsqrt.f32 %v193_v46 }
 0x14a   :  { %v766_v52 = vpop.eup %765 }
 0x14b   :  { %v195_v53 = vmul.f32 %v766_v52, %v87_v49 }
 0x14d   :  { %v199_v54 = vrot.slane %v195_v53, %v198_v50  ;;  %v609_v53 = vld [vmem:[%s971_s4] ss:$0 sm:$0xff] }
 0x14f   :  { %v200_v56 = vmul.f32 %v199_v54, %v184_v37 }
 0x151   :  { %v205_v57 = vadd.f32 %v204_v55, %v200_v56  ;;  %v610_v55 = vld [vmem:[#allocation2] ss:$0 sm:$0xff] }
 0x153   :  { %v206_v58 = vmax.f32 %v205_v57, 0.0 }
 0x155   :  { %v207_v59 = vpack.c.bf16 %v206_v58, %v206_v58 }
 0x157   :  { %684 = vmatmul.mubr.bf16.vlgmr.msra.gmra.mrb[0].mxu1 %v207_v59 }
 0x158   :  { %723 = vmatprep.mubr.msk.bf16.mxu1 %vm822_vm0, %v821_v1  ;;  %708 = vmatpush3.bf16.msra.mxu1 %v757_v8 }
 0x159   :  { %709 = vmatprep.subr.bf16.mxu1 %v821_v1 }
 0x15c   :  { %710 = vmatpush3.bf16.msra.mxu1 %v758_v9 }
 0x15d   :  { %711 = vmatprep.subr.bf16.mxu1 %v821_v1 }
 0x160   :  { %712 = vmatpush3.bf16.msra.mxu1 %v759_v11 }
 0x161   :  { %713 = vmatprep.subr.bf16.mxu1 %v821_v1 }
 0x164   :  { %714 = vmatpush3.bf16.msra.mxu1 %v760_v12 }
 0x165   :  { %715 = vmatprep.subr.bf16.mxu1 %v821_v1 }
 0x22a   :  { %v294_v0 = vpop.f32.mrb[0].mxu1 }
 0x22b   :  { %v295_v2 = vadd.f32 %v294_v0, %v211_v63  ;;  %v685_v3 = vpop.f32.mrb[1].mxu1 }
 0x22c   :  { %v297_v4 = vpop.f32.mrb[2].mxu1 }
 0x22d   :  { %v940_v5 = vadd.f32 %v295_v2, %v900_v10  ;;  %v686_v6 = vpop.f32.mrb[3].mxu1  ;;  %v761_v10 = vld [vmem:[#allocation5 + $0x60] sm:$0xff]  }
 0x22e   :  { %716 = vmatpush3.bf16.msra.mxu1 %v761_v10 }
 0x22f   :  { %v337_v7 = vpack.c.bf16 %v940_v5, %v940_v5  ;;  %717 = vmatprep.subr.bf16.mxu1 %v821_v1 }
 0x231   :  { %704 = vmatmul.mubr.bf16.vlgmr.msra.gmra.mrb[4].mxu0 %v337_v7 }
 0x232   :  { %718 = vmatpush3.bf16.msra.mxu1 %v762_v13 }
 0x233   :  { %719 = vmatprep.subr.bf16.mxu1 %v821_v1 }
 0x236   :  { %720 = vmatpush3.bf16.msra.mxu1 %v763_v14 }
 0x237   :  { %721 = vmatprep.subr.bf16.mxu1 %v821_v1 }
 0x23a   :  { %722 = vmatpush3.bf16.msra.mxu1 %v764_v15 }
 0x304   :  { %v420_v16 = vpop.f32.mrb[4].mxu0 }
 0x305   :  { %v426_v17 = vrot.slane %v420_v16, 4  ;;  %v705_v18 = vpop.f32.mrb[5].mxu0 }
 0x306   :  { %v423_v19 = vpop.f32.mrb[6].mxu0 }
 0x307   :  { %v427_v20 = vadd.f32 %v426_v17, %v420_v16  ;;  %v706_v21 = vpop.f32.mrb[7].mxu0 }
 0x309   :  { %v428_v22 = vrot.slane %v427_v20, 2 }
 0x30b   :  { %v429_v23 = vadd.f32 %v428_v22, %v427_v20 }
 0x30d   :  { %v430_v24 = vrot.slane %v429_v23, 1 }
 0x30f   :  { %v431_v25 = vadd.f32 %v430_v24, %v429_v23 }
 0x311   :  { %v432_v26 = vmul.f32 0.125, %v431_v25 }
 0x313   :  { %v433_v27 = vsub.f32 %v420_v16, %v432_v26 }
 0x315   :  { %v434_v28 = vmul.f32 %v433_v27, %v433_v27 }
 0x317   :  { %v435_v29 = vrot.slane %v434_v28, 4 }
 0x319   :  { %v436_v30 = vadd.f32 %v435_v29, %v434_v28 }
 0x31b   :  { %v437_v31 = vrot.slane %v436_v30, 2 }
 0x31d   :  { %v438_v32 = vadd.f32 %v437_v31, %v436_v30 }
 0x31f   :  { %v439_v1 = vrot.slane %v438_v32, 1 }
 0x321   :  { %v440_v33 = vadd.f32 %v439_v1, %v438_v32 }
 0x323   :  { %v441_v34 = vmul.f32 0.125, %v440_v33 }
 0x325   :  { %v442_v35 = vadd.f32 1e-05, %v441_v34 }
 0x327   :  { %767 = vrsqrt.f32 %v442_v35 }
 0x331   :  { %v768_v37 = vpop.eup %767 }
 0x332   :  { %v444_v38 = vmul.f32 %v768_v37, %v592_v36 }
 0x334   :  { %v448_v39 = vrot.slane %v444_v38, %v198_v50 }
 0x336   :  { %v449_v41 = vmul.f32 %v448_v39, %v433_v27 }
 0x338   :  { %v454_v42 = vadd.f32 %v453_v40, %v449_v41 }
 0x33a   :  { %v455_v43 = vmax.f32 %v454_v42, 0.0 }
 0x33c   :  { %v456_v44 = vpack.c.bf16 %v455_v43, %v455_v43 }
 0x33e   :  { %724 = vmatmul.mubr.bf16.vlgmr.msra.gmra.mrb[4].mxu1 %v456_v44 }
 0x411   :  { %v543_v46 = vpop.f32.mrb[4].mxu1 }
 0x412   :  { %v544_v47 = vadd.f32 %v543_v46, %v460_v45  ;;  %v725_v49 = vpop.f32.mrb[5].mxu1 }
 0x413   :  { %v546_v52 = vpop.f32.mrb[6].mxu1 }
 0x414   :  { %v726_v50 = vpop.f32.mrb[7].mxu1  ;;  %v549_v54 = vadd.f32 %v544_v47, %v940_v5 }
 0x416   :  { %v557_v51 = vmul.f32 %v609_v53, %v549_v54 }
 0x418   :  { %558 = vadd.xlane.f32.xlu0 %v557_v51 }
 0x4a5   :  { %v559_v56 = vpop.xlane.xlu0 %558 }
 0x4a6   :  { %v567_v57 = vadd.f32 %v610_v55, %v559_v56 }
 0x4a8   :  { %569 = vst.msk [vmem:[%s973_s6] sm:$0xff] %vm568_vm1, %v567_v57 }
 0x4a9   :  { %574 = vsyncpa [#allocation4], 1 }
 0x4aa   :  { %575 = vsyncpa [#allocation6], 1 }

</bundles_post_ra>
